<compile_context>
chip_gen: v7x
topology: tpu7x:2x2x1
jax: 0.10.0
libtpu: 0.0.40
codegen_flags: <defaults>
</compile_context>

<pallas_src>
import functools

import jax
import jax.numpy as jnp
from jax.experimental import pallas as pl
from jax.experimental.pallas import tpu as pltpu


def _round_up(x, m):
    return ((x + m - 1) // m) * m


def _cls_head_kernel(x_ref, w1_ref, b1_ref, w2_ref, b2_ref, out_ref):
    # x_ref:  [tb, H]   CLS-token features (native dtype)
    # w1_ref: [H, H]    dense weight, pre-transposed to [in, out]
    # b1_ref: [1, H]    f32
    # w2_ref: [H, Lp]   out_proj weight, pre-transposed + lane-padded
    # b2_ref: [1, Lp]   f32
    # out_ref:[tb, Lp]
    w1 = w1_ref[...]
    x = x_ref[...].astype(w1.dtype)

    # dense: [tb,H] @ [H,H], f32 accumulation on the MXU (no in-kernel transposes).
    h = jnp.dot(x, w1, preferred_element_type=jnp.float32)
    h = h + b1_ref[...]

    w2 = w2_ref[...]
    if w2.dtype == jnp.dtype(jnp.float32):
        h = jnp.tanh(h)                       # f32 EUP path (v5e has no bf16 EUP)
    else:
        # Fuse the downcast into the activation: bf16 tanh (v6e/v7x EUP) and no
        # separate VPU cast pass over the [tb, H] intermediate.
        h = jnp.tanh(h.astype(w2.dtype))

    # out_proj: [tb,H] @ [H,Lp], f32 accumulation.
    o = jnp.dot(h.astype(w2.dtype), w2, preferred_element_type=jnp.float32)
    out_ref[...] = (o + b2_ref[...]).astype(out_ref.dtype)


def prepare_head_params(dense_w, dense_b, out_w, out_b, *, param_dtype=None):
    """One-time parameter prep (do at load time, NOT per forward call):
      * transpose weights from PyTorch [out, in] to [in, out],
      * zero-pad out_proj to a lane-dense width (multiple of 128),
      * reshape biases to 2-D rows, kept in f32 (added to the f32 accumulator),
      * optionally cast weights (e.g. bf16) while keeping f32 accumulation.
    Returns (w1 [H,H], b1 [1,H], w2 [H,Lp], b2 [1,Lp], num_labels)."""
    H = dense_w.shape[1]
    L = out_w.shape[0]
    Lp = _round_up(L, 128)
    wdt = dense_w.dtype if param_dtype is None else param_dtype
    w1 = jnp.asarray(dense_w, wdt).T                                  # [H, H]  in->out
    b1 = jnp.asarray(dense_b, jnp.float32).reshape(1, H)              # [1, H]
    w2 = jnp.pad(jnp.asarray(out_w, wdt), ((0, Lp - L), (0, 0))).T    # [H, Lp] in->out
    b2 = jnp.pad(jnp.asarray(out_b, jnp.float32), (0, Lp - L)).reshape(1, Lp)
    return w1, b1, w2, b2, L


def _batch_tile(B, block_b):
    if B <= 8:
        return B                      # single block (full-extent sublane dim)
    # >= 2 grid steps so the "parallel" batch axis can feed both v7x TensorCores
    # (and megacore generally); tiles are multiples of 8 sublanes.
    return min(_round_up(pl.cdiv(B, 2), 8), block_b)


def roberta_classification_head(features, w1, b1, w2, b2, num_labels,
                                *, block_b=512):
    """features: [B, S, H]; w1/b1/w2/b2 from `prepare_head_params`.
    Returns logits [B, num_labels]."""
    B, S, H = features.shape
    Lp = w2.shape[1]
    L = num_labels

    # Dropout is identity in eval/inference mode.
    # TODO(synk): training-mode dropout (random masking + 1/(1-p) scaling) not implemented.

    tb = _batch_tile(B, block_b)
    grid = (pl.cdiv(B, tb),)

    if H % 128 == 0:
        # Fuse the CLS slice into the kernel DMA: view features as [B, S*H];
        # the first H lanes of each row are exactly features[:, 0, :], so the
        # BlockSpec only ever fetches the CLS token (S-fold HBM read reduction).
        x_in = features.reshape(B, S * H)                 # metadata-only reshape
    else:
        x_in = features[:, 0, :]                          # lane-unaligned fallback
    x_spec = pl.BlockSpec((tb, H), lambda i: (i, 0))

    # Explicit VMEM budget: resident weights + double-buffered x/out tiles +
    # f32 intermediates, with 2x headroom; capped at v7x's 64 MiB per-TC VMEM.
    fsz = jnp.dtype(features.dtype).itemsize
    wsz = jnp.dtype(w1.dtype).itemsize
    footprint = (H * H * wsz + H * Lp * wsz + (H + Lp) * 4
                 + 2 * tb * H * fsz + 2 * tb * Lp * fsz + 2 * tb * H * 4)
    vmem_limit = int(min(max(2 * footprint, 16 << 20), 64 << 20))

    flops = 2 * B * H * H + 2 * B * H * L
    bytes_accessed = int(B * H * fsz + H * H * wsz + L * H * wsz
                         + (H + L) * 4 + B * L * fsz)

    out = pl.pallas_call(
        _cls_head_kernel,
        out_shape=jax.ShapeDtypeStruct((B, Lp), features.dtype),
        grid_spec=pltpu.PrefetchScalarGridSpec(
            num_scalar_prefetch=0,
            grid=grid,
            in_specs=[
                x_spec,                                    # activations: tiled over B
                pl.BlockSpec((H, H), lambda i: (0, 0)),    # W1 [in,out]: resident
                pl.BlockSpec((1, H), lambda i: (0, 0)),    # b1
                pl.BlockSpec((H, Lp), lambda i: (0, 0)),   # W2 [in,out] (padded)
                pl.BlockSpec((1, Lp), lambda i: (0, 0)),   # b2 (padded)
            ],
            out_specs=pl.BlockSpec((tb, Lp), lambda i: (i, 0)),
        ),
        compiler_params=pltpu.CompilerParams(
            dimension_semantics=("parallel",),
            vmem_limit_bytes=vmem_limit),
        cost_estimate=pl.CostEstimate(
            flops=flops, transcendentals=B * H, bytes_accessed=bytes_accessed),
    )(x_in, w1, b1, w2, b2)

    return out[:, :L]


def make_roberta_classification_head(dense_w, dense_b, out_w, out_b,
                                     *, param_dtype=None, block_b=512):
    """Prep parameters once and return a jitted forward: features[B,S,H] -> [B,L]."""
    w1, b1, w2, b2, L = prepare_head_params(dense_w, dense_b, out_w, out_b,
                                            param_dtype=param_dtype)

    @jax.jit
    def head(features):
        return roberta_classification_head(features, w1, b1, w2, b2, L,
                                           block_b=block_b)

    return head


if __name__ == "__main__":
    # Small config consistent with the module: hidden_size=128, num_labels=3.
    B, S, H, L = 2, 8, 128, 3

    key = jax.random.PRNGKey(0)
    k_feat, k_w1, k_b1, k_w2, k_b2, k_feat2 = jax.random.split(key, 6)

    features = jax.random.normal(k_feat, (B, S, H), dtype=jnp.float32)

    # Deterministic parameter init (synthetic; no checkpoint load), PyTorch layout.
    dense_w = jax.random.normal(k_w1, (H, H), dtype=jnp.float32) * 0.02
    dense_b = jax.random.normal(k_b1, (H,), dtype=jnp.float32) * 0.02
    out_w = jax.random.normal(k_w2, (L, H), dtype=jnp.float32) * 0.02
    out_b = jax.random.normal(k_b2, (L,), dtype=jnp.float32) * 0.02

    # Plain-JAX reference (dropout identity in eval mode).
    def ref_head(f):
        x = f[:, 0, :]
        return jnp.tanh(x @ dense_w.T + dense_b) @ out_w.T + out_b

    # f32 path.
    head_f32 = make_roberta_classification_head(dense_w, dense_b, out_w, out_b)
    out = jax.block_until_ready(head_f32(features))
    assert out.shape == (B, L)
    assert jnp.allclose(out, ref_head(features), atol=1e-5, rtol=1e-5)

    # bf16-weight path (f32 accumulation): halves the dominant W1 HBM read.
    head_bf16 = make_roberta_classification_head(dense_w, dense_b, out_w, out_b,
                                                 param_dtype=jnp.bfloat16)
    out_bf16 = jax.block_until_ready(head_bf16(features))
    assert out_bf16.shape == (B, L)
    assert jnp.allclose(out_bf16.astype(jnp.float32), ref_head(features),
                        atol=3e-2, rtol=3e-2)

    # Multi-step grid + partial last block (exercises batch tiling & masking).
    B2 = 20
    features2 = jax.random.normal(k_feat2, (B2, S, H), dtype=jnp.float32)
    out2 = jax.block_until_ready(head_f32(features2))
    assert out2.shape == (B2, L)
    assert jnp.allclose(out2, ref_head(features2), atol=1e-5, rtol=1e-5)

    print("KERNEL_OK")
</pallas_src>

<mosaic_0001>
module attributes {stable_mosaic.version = 11 : i64} {
  func.func @_cls_head_kernel(%arg0: i32, %arg1: memref<2x128xf32, #tpu.memory_space<vmem>>, %arg2: memref<128x128xf32, #tpu.memory_space<vmem>>, %arg3: memref<1x128xf32, #tpu.memory_space<vmem>>, %arg4: memref<128x128xf32, #tpu.memory_space<vmem>>, %arg5: memref<1x128xf32, #tpu.memory_space<vmem>>, %arg6: memref<2x128xf32, #tpu.memory_space<vmem>>) attributes {dimension_semantics = [#tpu.dimension_semantics<parallel>], iteration_bounds = array<i64: 1>, scalar_prefetch = 0 : i64, scratch_operands = 0 : i64, tpu.core_type = #tpu.core_type<tc>, window_params = [{transform_indices = @transform_0, window_bounds = array<i64: 2, 128>}, {pipeline_mode = #tpu.pipeline_mode<synchronous>, transform_indices = @transform_1, window_bounds = array<i64: 128, 128>}, {pipeline_mode = #tpu.pipeline_mode<synchronous>, transform_indices = @transform_2, window_bounds = array<i64: 1, 128>}, {pipeline_mode = #tpu.pipeline_mode<synchronous>, transform_indices = @transform_3, window_bounds = array<i64: 128, 128>}, {pipeline_mode = #tpu.pipeline_mode<synchronous>, transform_indices = @transform_4, window_bounds = array<i64: 1, 128>}, {transform_indices = @transform_5, window_bounds = array<i64: 2, 128>}]} {
    %c0 = arith.constant 0 : index
    %c0_0 = arith.constant 0 : index
    %0 = vector.load %arg2[%c0, %c0_0] : memref<128x128xf32, #tpu.memory_space<vmem>>, vector<128x128xf32>
    %c0_1 = arith.constant 0 : index
    %c0_2 = arith.constant 0 : index
    %1 = vector.load %arg1[%c0_1, %c0_2] : memref<2x128xf32, #tpu.memory_space<vmem>>, vector<2x128xf32>
    %cst = arith.constant dense<0.000000e+00> : vector<2x128xf32>
    %2 = tpu.matmul %1, %0, %cst {dimension_numbers = #tpu.dot_dimension_numbers<[1], [0], [0], [1], [0, 0, 1, 1], [], []>} : vector<2x128xf32>, vector<128x128xf32>, vector<2x128xf32> -> vector<2x128xf32>
    %c0_3 = arith.constant 0 : index
    %c0_4 = arith.constant 0 : index
    %3 = vector.load %arg3[%c0_3, %c0_4] : memref<1x128xf32, #tpu.memory_space<vmem>>, vector<1x128xf32>
    %4 = vector.broadcast %3 : vector<1x128xf32> to vector<2x128xf32>
    %5 = arith.addf %2, %4 : vector<2x128xf32>
    %c0_5 = arith.constant 0 : index
    %c0_6 = arith.constant 0 : index
    %6 = vector.load %arg4[%c0_5, %c0_6] : memref<128x128xf32, #tpu.memory_space<vmem>>, vector<128x128xf32>
    %7 = math.tanh %5 : vector<2x128xf32>
    %cst_7 = arith.constant dense<0.000000e+00> : vector<2x128xf32>
    %8 = tpu.matmul %7, %6, %cst_7 {dimension_numbers = #tpu.dot_dimension_numbers<[1], [0], [0], [1], [0, 0, 1, 1], [], []>} : vector<2x128xf32>, vector<128x128xf32>, vector<2x128xf32> -> vector<2x128xf32>
    %c0_8 = arith.constant 0 : index
    %c0_9 = arith.constant 0 : index
    %9 = vector.load %arg5[%c0_8, %c0_9] : memref<1x128xf32, #tpu.memory_space<vmem>>, vector<1x128xf32>
    %10 = vector.broadcast %9 : vector<1x128xf32> to vector<2x128xf32>
    %11 = arith.addf %8, %10 : vector<2x128xf32>
    %c0_10 = arith.constant 0 : index
    %c0_11 = arith.constant 0 : index
    %12 = vector.load %arg6[%c0_10, %c0_11] : memref<2x128xf32, #tpu.memory_space<vmem>>, vector<2x128xf32>
    tpu.vector_store %arg6[%c0_10, %c0_11], %11 {strides = array<i32>} : memref<2x128xf32, #tpu.memory_space<vmem>>, vector<2x128xf32>,
    return
  }
  func.func @transform_0(%arg0: i32) -> (i32, i32) {
    %c0_i32 = arith.constant 0 : i32
    %c0_i32_0 = arith.constant 0 : i32
    return %arg0, %c0_i32 : i32, i32
  }
  func.func @transform_1(%arg0: i32) -> (i32, i32) {
    %c0_i32 = arith.constant 0 : i32
    %c0_i32_0 = arith.constant 0 : i32
    %c0_i32_1 = arith.constant 0 : i32
    return %c0_i32, %c0_i32_0 : i32, i32
  }
  func.func @transform_2(%arg0: i32) -> (i32, i32) {
    %c0_i32 = arith.constant 0 : i32
    %c0_i32_0 = arith.constant 0 : i32
    %c0_i32_1 = arith.constant 0 : i32
    return %c0_i32, %c0_i32_0 : i32, i32
  }
  func.func @transform_3(%arg0: i32) -> (i32, i32) {
    %c0_i32 = arith.constant 0 : i32
    %c0_i32_0 = arith.constant 0 : i32
    %c0_i32_1 = arith.constant 0 : i32
    return %c0_i32, %c0_i32_0 : i32, i32
  }
  func.func @transform_4(%arg0: i32) -> (i32, i32) {
    %c0_i32 = arith.constant 0 : i32
    %c0_i32_0 = arith.constant 0 : i32
    %c0_i32_1 = arith.constant 0 : i32
    return %c0_i32, %c0_i32_0 : i32, i32
  }
  func.func @transform_5(%arg0: i32) -> (i32, i32) {
    %c0_i32 = arith.constant 0 : i32
    %c0_i32_0 = arith.constant 0 : i32
    return %arg0, %c0_i32 : i32, i32
  }
}

</mosaic_0001>

<bundles_post_ra>
// kernel: head.1
= control target key start
LH: loop header
LB: loop body
LE: loop exit
PB: predicated region body
PF: predicated region fallthrough
CT: control target
= control target key end

     0   :  { %10 = vsyncpa [#allocation3], 0  ;;  %s589_s0 = inlined_call_operand.vmem [shape: f32[2,1024], index: 0, kind: input, shape index: {}]   ;;  %s590_s1 = inlined_call_operand.hbm [shape: f32[128,128], index: 1, kind: input, shape index: {}]   ;;  %s591_s2 = inlined_call_operand.vmem [shape: f32[1,128], index: 2, kind: input, shape index: {}]   ;;  %s592_s3 = inlined_call_operand.hbm [shape: f32[128,128], index: 3, kind: input, shape index: {}]   ;;  %s593_s4 = inlined_call_operand.vmem [shape: f32[1,128], index: 4, kind: input, shape index: {}]   ;;  %s594_s5 = inlined_call_operand.hbm [shape: f32[2,128], index: 5, kind: output, shape index: {}]  }
   0x1   :  { %11 = vsyncpa [#allocation6], 0 }
   0x2   :  { %12 = vsyncpa [#allocation4], 0  ;;  %s490_s18 = smov [#allocation2]   ;;  %s418_s22 = scalar_lea.hbm %s590_s1, 2048 }
   0x3   :  { %s20_s19 = sshll.u32 %s490_s18, 4  ;;  %p419_p0 = scmp.ne.s32.totalorder %s590_s1, %s418_s22  ;;  %s21_s19 = int_to_ptr.vmem [resolvable:$true] %s20_s19 }
   0x4   :  { %p422_p1 = scmp.lt.u32.totalorder %s418_s22, %s590_s1 }
   0x6   :  { %p424_p2 = pnand %p422_p1, %p419_p0 }
   0x8   :  { %427 = shalt.err (!%p424_p2)
}
   0x9   :  { %s428_s27 = scalar_lea.vmem %s21_s19, 2048  ;;  %p433_p4 = scmp.lt.s32.totalorder %s21_s19, %s21_s19 }
   0xa   :  { %p429_p3 = scmp.ne.s32.totalorder %s21_s19, %s428_s27  ;;  %p434_p5 = scmp.lt.s32.totalorder %s428_s27, %s428_s27 }
   0xc   :  { %p435_p6 = por %p434_p5, %p433_p4 }
   0xe   :  { %p436_p7 = pnand %p435_p6, %p429_p3 }
  0x10   :  { %439 = shalt.err (!%p436_p7)
}
  0x11   :  { %s491_s28 = smov 128   ;;  %s492_s29 = smov 8  }
  0x12   :  { %26 = dma.hbm_to_vmem [thread:$0]  %s590_s1, 2048, %s21_s19, [#allocation3], %s491_s28, %s491_s28, %s492_s29  }
  0x13   :  { %s493_s7 = smov [#allocation5]   ;;  %s440_s11 = scalar_lea.hbm %s592_s3, 2048 }
  0x14   :  { %s34_s8 = sshll.u32 %s493_s7, 4  ;;  %p441_p8 = scmp.ne.s32.totalorder %s592_s3, %s440_s11  ;;  %s35_s8 = int_to_ptr.vmem [resolvable:$true] %s34_s8 }
  0x15   :  { %p444_p9 = scmp.lt.u32.totalorder %s440_s11, %s592_s3 }
  0x17   :  { %p446_p10 = pnand %p444_p9, %p441_p8 }
  0x19   :  { %449 = shalt.err (!%p446_p10)
}
  0x1a   :  { %s450_s16 = scalar_lea.vmem %s35_s8, 2048  ;;  %p455_p12 = scmp.lt.s32.totalorder %s35_s8, %s35_s8 }
  0x1b   :  { %p451_p11 = scmp.ne.s32.totalorder %s35_s8, %s450_s16  ;;  %p456_p13 = scmp.lt.s32.totalorder %s450_s16, %s450_s16 }
  0x1d   :  { %p457_p0 = por %p456_p13, %p455_p12 }
  0x1f   :  { %p458_p1 = pnand %p457_p0, %p451_p11 }
  0x21   :  { %461 = shalt.err (!%p458_p1)
}
  0x22   :  { %40 = dma.hbm_to_vmem [thread:$0]  %s592_s3, 2048, %s35_s8, [#allocation6], %s491_s28, %s491_s28, %s492_s29  }
  0x23   :  { %484 = dma.done.wait [#allocation3], 2048  }
  0x24   :  { %485 = vsyncadd [#allocation3], 4294965248 }
  0x25   :  { %486 = dma.done.wait [#allocation6], 2048  }
  0x26   :  { %487 = vsyncadd [#allocation6], 4294965248  ;;  %v494_v0 = vmov 0.0|0.0   ;;  %vm495_vm0 = vmmov 0   ;;  %v496_v1 = vmov 0.0   ;;  %v49_v2 = vld [vmem:[#allocation2] sm:$0xff] }
  0x27   :  { %360 = vmatprep.subr.bf16.mxu0 %v494_v0  ;;  %322 = vmatprep.mubr.msk.f32.mxu0 %vm495_vm0, %v496_v1  ;;  %v50_v3 = vld [vmem:[#allocation2 + $0x8] sm:$0xff]  ;;  %v51_v4 = vld [vmem:[#allocation2 + $0x10] sm:$0xff]  ;;  %v52_v6 = vld [vmem:[#allocation2 + $0x18] sm:$0xff]  ;;  %s497_s22 = smov [#allocation7]  }
  0x28   :  { %384 = vmatprep.subr.bf16.mxu1 %v494_v0  ;;  %357 = vmatprep.mubr.msk.f32.mxu1 %vm495_vm0, %v496_v1  ;;  %v361_v5 = vpack.c.bf16 %v50_v3, %v49_v2  ;;  %v364_v7 = vpack.c.bf16 %v52_v6, %v51_v4  ;;  %v53_v8 = vld [vmem:[#allocation2 + $0x20] sm:$0xff]  ;;  %v54_v9 = vld [vmem:[#allocation2 + $0x28] sm:$0xff]  ;;  %v145_v12 = vld [vmem:[#allocation5 + $0x10] sm:$0xff]  ;;  %s244_s23 = sshll.u32 %s497_s22, 4  ;;  %s245_s23 = int_to_ptr.vmem [resolvable:$true] %s244_s23 }
  0x29   :  { %v143_v10 = vld [vmem:[#allocation5] sm:$0xff]  ;;  %v144_v11 = vld [vmem:[#allocation5 + $0x8] sm:$0xff]  ;;  %v146_v13 = vld [vmem:[#allocation5 + $0x18] sm:$0xff]  ;;  %v367_v14 = vpack.c.bf16 %v54_v9, %v53_v8  ;;  %s462_s24 = scalar_lea.vmem %s245_s23, 32  ;;  %p467_p3 = scmp.lt.s32.totalorder %s245_s23, %s245_s23 }
  0x2a   :  { %362 = vmatpush3.bf16.msra.mxu0 %v361_v5  ;;  %v385_v15 = vpack.c.bf16 %v144_v11, %v143_v10  ;;  %v55_v16 = vld [vmem:[#allocation2 + $0x30] sm:$0xff]  ;;  %v56_v17 = vld [vmem:[#allocation2 + $0x38] sm:$0xff]  ;;  %v388_v18 = vpack.c.bf16 %v146_v13, %v145_v12  ;;  %v147_v19 = vld [vmem:[#allocation5 + $0x20] sm:$0xff]  ;;  %p463_p2 = scmp.ne.s32.totalorder %s245_s23, %s462_s24  ;;  %p468_p4 = scmp.lt.s32.totalorder %s462_s24, %s462_s24 }
  0x2b   :  { %363 = vmatprep.subr.bf16.mxu0 %v494_v0  ;;  %v148_v20 = vld [vmem:[#allocation5 + $0x28] sm:$0xff]  ;;  %v370_v21 = vpack.c.bf16 %v56_v17, %v55_v16  ;;  %v57_v22 = vld [vmem:[#allocation2 + $0x40] sm:$0xff]  ;;  %v149_v25 = vld [vmem:[#allocation5 + $0x30] sm:$0xff] }
  0x2c   :  { %386 = vmatpush3.bf16.msra.mxu1 %v385_v15  ;;  %v58_v23 = vld [vmem:[#allocation2 + $0x48] sm:$0xff]  ;;  %v391_v24 = vpack.c.bf16 %v148_v20, %v147_v19  ;;  %v150_v26 = vld [vmem:[#allocation5 + $0x38] sm:$0xff]  ;;  %v59_v28 = vld [vmem:[#allocation2 + $0x50] sm:$0xff]  ;;  %p469_p5 = por %p468_p4, %p467_p3 }
  0x2d   :  { %387 = vmatprep.subr.bf16.mxu1 %v494_v0  ;;  %v373_v27 = vpack.c.bf16 %v58_v23, %v57_v22  ;;  %v60_v29 = vld [vmem:[#allocation2 + $0x58] sm:$0xff]  ;;  %v394_v30 = vpack.c.bf16 %v150_v26, %v149_v25  ;;  %v151_v31 = vld [vmem:[#allocation5 + $0x40] sm:$0xff]  ;;  %v152_v32 = vld [vmem:[#allocation5 + $0x48] sm:$0xff] }
  0x2e   :  { %365 = vmatpush3.bf16.msra.mxu0 %v364_v7  ;;  %v376_v33 = vpack.c.bf16 %v60_v29, %v59_v28  ;;  %v61_v34 = vld [vmem:[#allocation2 + $0x60] sm:$0xff]  ;;  %v62_v35 = vld [vmem:[#allocation2 + $0x68] sm:$0xff]  ;;  %v397_v36 = vpack.c.bf16 %v152_v32, %v151_v31  ;;  %v63_v38 = vld [vmem:[#allocation2 + $0x70] sm:$0xff]  ;;  %p470_p6 = pnand %p469_p5, %p463_p2 }
  0x2f   :  { %366 = vmatprep.subr.bf16.mxu0 %v494_v0  ;;  %v379_v37 = vpack.c.bf16 %v62_v35, %v61_v34  ;;  %v64_v39 = vld [vmem:[#allocation2 + $0x78] sm:$0xff]  ;;  %v65_v41 = vld [vmem:[%s589_s0] sm:$0x3]  ;;  %v153_v42 = vld [vmem:[#allocation5 + $0x50] sm:$0xff] }
  0x30   :  { %389 = vmatpush3.bf16.msra.mxu1 %v388_v18  ;;  %v382_v40 = vpack.c.bf16 %v64_v39, %v63_v38  ;;  %v154_v43 = vld [vmem:[#allocation5 + $0x58] sm:$0xff]  ;;  %v155_v45 = vld [vmem:[#allocation5 + $0x60] sm:$0xff]  ;;  %v156_v46 = vld [vmem:[#allocation5 + $0x68] sm:$0xff] }
  0x31   :  { %390 = vmatprep.subr.bf16.mxu1 %v494_v0  ;;  %v400_v44 = vpack.c.bf16 %v154_v43, %v153_v42  ;;  %v403_v47 = vpack.c.bf16 %v156_v46, %v155_v45  ;;  %v157_v48 = vld [vmem:[#allocation5 + $0x70] sm:$0xff]  ;;  %v158_v49 = vld [vmem:[#allocation5 + $0x78] sm:$0xff]  ;;  %v254_v51 = vld [vmem:[%s591_s2] ss:$0 sm:$0xff] }
  0x32   :  { %368 = vmatpush3.bf16.msra.mxu0 %v367_v14  ;;  %v406_v50 = vpack.c.bf16 %v158_v49, %v157_v48  ;;  %v255_v56 = vld [vmem:[%s593_s4] ss:$0 sm:$0xff] }
  0x33   :  { %369 = vmatprep.subr.bf16.mxu0 %v494_v0 }
  0x34   :  { %392 = vmatpush3.bf16.msra.mxu1 %v391_v24 }
  0x35   :  { %393 = vmatprep.subr.bf16.mxu1 %v494_v0 }
  0x36   :  { %371 = vmatpush3.bf16.msra.mxu0 %v370_v21 }
  0x37   :  { %372 = vmatprep.subr.bf16.mxu0 %v494_v0 }
  0x38   :  { %395 = vmatpush3.bf16.msra.mxu1 %v394_v30 }
  0x39   :  { %396 = vmatprep.subr.bf16.mxu1 %v494_v0 }
  0x3a   :  { %374 = vmatpush3.bf16.msra.mxu0 %v373_v27 }
  0x3b   :  { %375 = vmatprep.subr.bf16.mxu0 %v494_v0 }
  0x3c   :  { %398 = vmatpush3.bf16.msra.mxu1 %v397_v36 }
  0x3d   :  { %399 = vmatprep.subr.bf16.mxu1 %v494_v0 }
  0x3e   :  { %377 = vmatpush3.bf16.msra.mxu0 %v376_v33 }
  0x3f   :  { %378 = vmatprep.subr.bf16.mxu0 %v494_v0 }
  0x40   :  { %401 = vmatpush3.bf16.msra.mxu1 %v400_v44 }
  0x41   :  { %402 = vmatprep.subr.bf16.mxu1 %v494_v0 }
  0x42   :  { %380 = vmatpush3.bf16.msra.mxu0 %v379_v37 }
  0x43   :  { %381 = vmatprep.subr.bf16.mxu0 %v494_v0 }
  0x44   :  { %404 = vmatpush3.bf16.msra.mxu1 %v403_v47 }
  0x45   :  { %405 = vmatprep.subr.bf16.mxu1 %v494_v0 }
  0x46   :  { %383 = vmatpush3.bf16.msra.mxu0 %v382_v40 }
  0x48   :  { %407 = vmatpush3.bf16.msra.mxu1 %v406_v50 }
  0x49   :  { %323 = vmatmul.mubr.f32.vlgmr.msra.gmra.mrb[0].mxu0 %v65_v41 }
 0x11c   :  { %v139_v52 = vpop.f32.mrb[0].mxu0 }
 0x11d   :  { %v140_v53 = vadd.f32 %v254_v51, %v139_v52  ;;  %v324_v54 = vpop.f32.mrb[1].mxu0 }
 0x11f   :  { %416 = vtanh.f32 %v140_v53 }
 0x129   :  { %v417_v55 = vpop.eup %416 }
 0x12a   :  { %358 = vmatmul.mubr.f32.vlgmr.msra.gmra.mrb[0].mxu1 %v417_v55 }
 0x1fd   :  { %v233_v57 = vpop.f32.mrb[0].mxu1 }
 0x1fe   :  { %v234_v58 = vadd.f32 %v255_v56, %v233_v57  ;;  %v359_v59 = vpop.f32.mrb[1].mxu1 }
 0x200   :  { %237 = vst [vmem:[#allocation7] sm:$0x3] %v234_v58 }
 0x201   :  { %473 = shalt.err (!%p470_p6)
}
 0x202   :  { %s474_s26 = scalar_lea.hbm %s594_s5, 32 }
 0x203   :  { %p475_p7 = scmp.ne.s32.totalorder %s594_s5, %s474_s26  ;;  %p478_p8 = scmp.lt.u32.totalorder %s474_s26, %s594_s5 }
 0x205   :  { %p480_p9 = pnand %p478_p8, %p475_p7 }
 0x207   :  { %483 = shalt.err (!%p480_p9)
}
 0x208   :  { %247 = dma.vmem_to_hbm [thread:$0]  %s245_s23, 32, %s594_s5, [#allocation4]  }
 0x209   :  { %488 = dma.done.wait [#allocation4], 32  }
 0x20a   :  { %489 = vsyncadd [#allocation4], 4294967264 }
 0x20b   :  { %251 = vsyncpa [#allocation3], 1 }
 0x20c   :  { %252 = vsyncpa [#allocation6], 1 }
 0x20d   :  { %253 = vsyncpa [#allocation4], 1 }

</bundles_post_ra>
